<compile_context>
chip_gen: v6e
topology: v6e:2x2x1
jax: 0.10.0
libtpu: 0.0.40
codegen_flags: <defaults>
</compile_context>

<pallas_src>
import jax
import jax.numpy as jnp
from jax import lax
from jax.experimental import pallas as pl
from jax.experimental.pallas import tpu as pltpu


def _rmsnorm_kernel(x_ref, w_ref, o_ref, *, eps):
    """One (TM, D) tile: out = weight * type_as(x)(x * rsqrt(mean(x^2) + eps))."""
    x32 = x_ref[...].astype(jnp.float32)                        # x.float()
    ms = jnp.mean(x32 * x32, axis=-1, keepdims=True)            # x.pow(2).mean(-1)
    normed = x32 * lax.rsqrt(ms + eps)                          # x * rsqrt(ms + eps)
    if x_ref.dtype != jnp.float32:
        # Reproduce torch's `.type_as(x)` rounding for low-precision inputs.
        # For f32 inputs this is a no-op, so we skip the two extra cast passes.
        normed = normed.astype(x_ref.dtype).astype(jnp.float32)
    out = w_ref[...].astype(jnp.float32) * normed               # weight * (...)
    o_ref[...] = out.astype(o_ref.dtype)


def _round_up(a, b):
    return ((a + b - 1) // b) * b


def _round_down(a, b):
    return (a // b) * b


def _vmem_capacity_bytes():
    try:
        return int(pltpu.get_tpu_info().vmem_capacity_bytes)  # 128 MiB v5e/v6e, 64 MiB v7x
    except Exception:
        return 64 * 1024 * 1024                                # conservative fallback


def _num_tensorcores():
    """Best-effort TensorCores-per-chip (2 on megacore chips), clamped to [1, 2]."""
    try:
        kind = jax.devices()[0].device_kind.lower()
        if "lite" in kind or "v5e" in kind or "v6e" in kind:
            return 1
        if "v4" in kind or "v5p" in kind or "v7" in kind:
            return 2
    except Exception:
        pass
    return 1


def rmsnorm_reference(x, weight, eps=1e-6):
    """Pure-JAX reference matching the PyTorch module."""
    x32 = x.astype(jnp.float32)
    normed = x32 * lax.rsqrt(jnp.mean(x32 * x32, axis=-1, keepdims=True) + eps)
    normed = normed.astype(x.dtype).astype(jnp.float32)   # torch `.type_as(x)`
    return weight.astype(jnp.float32) * normed


def rmsnorm(x, weight, eps=1e-6, out_dtype=None, max_block_rows=1024):
    """RMSNorm over the last axis of x, matching the PyTorch module semantics.

    out_dtype defaults to the torch promotion (float32 weight * x -> float32).
    Callers that accept x-dtype (e.g. bf16) output may pass out_dtype=x.dtype to
    cut write traffic on this bandwidth-bound kernel (recommended on v7x when the
    consumer tolerates it; note this changes the output dtype vs. the module).
    """
    orig_shape = x.shape
    dim = orig_shape[-1]
    assert weight.shape == (dim,)
    # NOTE: best performance requires dim to be a multiple of 128 (lane width).
    # Smaller dims still compile (block == full last dim) but use masked stores.

    rows = 1
    for s in orig_shape[:-1]:
        rows *= s
    x2d = x.reshape(rows, dim)
    w2d = weight.reshape(1, dim).astype(jnp.float32)

    if out_dtype is None:
        out_dtype = jnp.result_type(jnp.float32, x.dtype)

    in_bytes = jnp.dtype(x.dtype).itemsize
    o_bytes = jnp.dtype(out_dtype).itemsize
    # Dtype-native sublane packing: 8 rows f32, 16 bf16, 32 int8/fp8.
    sublane = max(8, 32 // max(1, in_bytes))

    # --- VMEM-aware row-tile sizing (per TPU generation) ---------------------
    vmem_cap = _vmem_capacity_bytes()
    # Pipelined buffers get ~1/3 of VMEM; the rest covers the kernel's f32
    # intermediates, the weight buffers and compiler headroom.
    budget = min(vmem_cap // 3, 48 * 1024 * 1024)

    row_io_bytes = dim * (in_bytes + o_bytes)   # double-buffered x tile + out tile
    row_tmp_bytes = dim * 4                     # f32 intermediates inside the body
    w_bytes = dim * 4

    # Guard: extremely wide dim where even a minimal-row tile cannot fit.
    min_rows = min(rows, sublane)
    if (2 * min_rows * row_io_bytes + min_rows * row_tmp_bytes + 2 * w_bytes) > vmem_cap // 2:
        # TODO(synk): add a lane-tiled two-pass RMSNorm kernel for extremely wide
        # hidden dims; fall back to the correct (unfused) pure-JAX path here.
        return rmsnorm_reference(x, weight, eps).astype(out_dtype).reshape(orig_shape)

    budget_rows = max(1, budget // (2 * row_io_bytes + row_tmp_bytes))
    tm = min(budget_rows, max_block_rows, rows)

    ncores = _num_tensorcores()
    if ncores > 1 and rows >= 2 * ncores * sublane:
        # Megacore (v7x): guarantee >= 2 grid steps per TensorCore so the software
        # pipeline can overlap VPU/cast work and writeback with the next DMA.
        # Single-TC chips (v5e/v6e) keep the largest tile (no split overhead).
        tm = min(tm, _round_up(pl.cdiv(rows, 2 * ncores), sublane))

    if tm >= rows:
        tm = rows                                   # single full-extent block (always legal)
    else:
        tm = max(sublane, _round_down(tm, sublane)) # sublane-aligned interior blocks
        if tm >= rows:
            tm = rows

    grid_m = pl.cdiv(rows, tm)
    # NOTE: no jnp.pad / output slice for ragged rows.  Rows are independent, so
    # the partial last block (if any) is handled by Pallas: OOB-row reads feed
    # harmless garbage into an independent row's math and OOB writes are masked.

    # Explicit VMEM limit sized from the actual tile footprint (+ headroom),
    # including the in-body f32 intermediates.  Weight keeps the default double
    # buffer (constant index_map -> no re-DMA; 2*dim*4 bytes is negligible).
    tile_bytes = tm * row_io_bytes
    vmem_needed = 2 * tile_bytes + tm * row_tmp_bytes + 2 * w_bytes
    vmem_limit = int(min(max(vmem_needed + (8 << 20), 32 << 20), vmem_cap * 3 // 4))

    kernel = lambda xr, wr, orf: _rmsnorm_kernel(xr, wr, orf, eps=eps)

    out2d = pl.pallas_call(
        kernel,
        out_shape=jax.ShapeDtypeStruct((rows, dim), out_dtype),
        grid_spec=pltpu.PrefetchScalarGridSpec(
            num_scalar_prefetch=0,
            grid=(grid_m,),
            in_specs=[
                pl.BlockSpec((tm, dim), lambda i: (i, 0)),   # x tile
                pl.BlockSpec((1, dim), lambda i: (0, 0)),    # weight (same every step)
            ],
            out_specs=pl.BlockSpec((tm, dim), lambda i: (i, 0)),
        ),
        compiler_params=pltpu.CompilerParams(
            dimension_semantics=("parallel",),
            vmem_limit_bytes=vmem_limit,
        ),
    )(x2d, w2d)

    return out2d.reshape(orig_shape)


if __name__ == "__main__":
    key = jax.random.PRNGKey(0)
    k1, k2, k3 = jax.random.split(key, 3)

    # Shapes implied by the module: (batch, seq, hidden), normalized over hidden.
    batch, seq, hidden = 2, 8, 32
    x = jax.random.normal(k1, (batch, seq, hidden), dtype=jnp.float32)
    weight = 1.0 + 0.1 * jax.random.normal(k3, (hidden,), dtype=jnp.float32)

    out = jax.block_until_ready(rmsnorm(x, weight, eps=1e-6))
    ref = rmsnorm_reference(x, weight, eps=1e-6)
    assert out.shape == x.shape and out.dtype == ref.dtype
    assert jnp.allclose(out, ref, atol=1e-5, rtol=1e-5), "f32 mismatch vs reference"

    # Second check: bf16 input, lane-dense dim=128, row count (15) that is not a
    # sublane multiple (exercises the no-pad ragged path and `.type_as(x)`).
    b2, s2, h2 = 3, 5, 128
    xb = jax.random.normal(k2, (b2, s2, h2), dtype=jnp.float32).astype(jnp.bfloat16)
    wb = jnp.ones((h2,), dtype=jnp.float32)
    outb = jax.block_until_ready(rmsnorm(xb, wb, eps=1e-6))
    refb = rmsnorm_reference(xb, wb, eps=1e-6)
    assert outb.shape == xb.shape
    assert jnp.allclose(outb, refb, atol=2e-2, rtol=2e-2), "bf16 mismatch vs reference"

    print("KERNEL_OK")
</pallas_src>

<mosaic_0001>
module attributes {stable_mosaic.version = 11 : i64} {
  func.func @_lambda_(%arg0: i32, %arg1: memref<16x32xf32, #tpu.memory_space<vmem>>, %arg2: memref<1x32xf32, #tpu.memory_space<vmem>>, %arg3: memref<16x32xf32, #tpu.memory_space<vmem>>) attributes {dimension_semantics = [#tpu.dimension_semantics<parallel>], iteration_bounds = array<i64: 1>, scalar_prefetch = 0 : i64, scratch_operands = 0 : i64, tpu.core_type = #tpu.core_type<tc>, window_params = [{transform_indices = @transform_0, window_bounds = array<i64: 16, 32>}, {pipeline_mode = #tpu.pipeline_mode<synchronous>, transform_indices = @transform_1, window_bounds = array<i64: 1, 32>}, {transform_indices = @transform_2, window_bounds = array<i64: 16, 32>}]} {
    %c0 = arith.constant 0 : index
    %c0_0 = arith.constant 0 : index
    %0 = vector.load %arg1[%c0, %c0_0] : memref<16x32xf32, #tpu.memory_space<vmem>>, vector<16x32xf32>
    %1 = arith.mulf %0, %0 : vector<16x32xf32>
    %cst = arith.constant dense<0.000000e+00> : vector<16xf32>
    %2 = vector.multi_reduction <add>, %1, %cst [1] : vector<16x32xf32> to vector<16xf32>
    %3 = vector.shape_cast %2 : vector<16xf32> to vector<16x1xf32>
    %cst_1 = arith.constant 3.200000e+01 : f32
    %4 = vector.broadcast %cst_1 : f32 to vector<16x1xf32>
    %5 = arith.divf %3, %4 : vector<16x1xf32>
    %cst_2 = arith.constant 9.99999997E-7 : f32
    %6 = vector.broadcast %cst_2 : f32 to vector<16x1xf32>
    %7 = arith.addf %5, %6 : vector<16x1xf32>
    %8 = math.rsqrt %7 : vector<16x1xf32>
    %9 = vector.broadcast %8 : vector<16x1xf32> to vector<16x32xf32>
    %10 = arith.mulf %0, %9 : vector<16x32xf32>
    %c0_3 = arith.constant 0 : index
    %c0_4 = arith.constant 0 : index
    %11 = vector.load %arg2[%c0_3, %c0_4] : memref<1x32xf32, #tpu.memory_space<vmem>>, vector<1x32xf32>
    %12 = vector.broadcast %11 : vector<1x32xf32> to vector<16x32xf32>
    %13 = arith.mulf %12, %10 : vector<16x32xf32>
    %c0_5 = arith.constant 0 : index
    %c0_6 = arith.constant 0 : index
    %14 = vector.load %arg3[%c0_5, %c0_6] : memref<16x32xf32, #tpu.memory_space<vmem>>, vector<16x32xf32>
    tpu.vector_store %arg3[%c0_5, %c0_6], %13 {strides = array<i32>} : memref<16x32xf32, #tpu.memory_space<vmem>>, vector<16x32xf32>,
    return
  }
  func.func @transform_0(%arg0: i32) -> (i32, i32) {
    %c0_i32 = arith.constant 0 : i32
    %c0_i32_0 = arith.constant 0 : i32
    return %arg0, %c0_i32 : i32, i32
  }
  func.func @transform_1(%arg0: i32) -> (i32, i32) {
    %c0_i32 = arith.constant 0 : i32
    %c0_i32_0 = arith.constant 0 : i32
    %c0_i32_1 = arith.constant 0 : i32
    return %c0_i32, %c0_i32_0 : i32, i32
  }
  func.func @transform_2(%arg0: i32) -> (i32, i32) {
    %c0_i32 = arith.constant 0 : i32
    %c0_i32_0 = arith.constant 0 : i32
    return %arg0, %c0_i32 : i32, i32
  }
}

</mosaic_0001>

<bundles_post_ra>
// kernel: tpu_custom_call.1
= control target key start
LH: loop header
LB: loop body
LE: loop exit
PB: predicated region body
PF: predicated region fallthrough
CT: control target
= control target key end

     0   :  { %7 = vsyncpa [#allocation3], 0  ;;  %s165_s0 = inlined_call_operand.hbm [shape: f32[16,32], index: 0, kind: input, shape index: {}]   ;;  %s166_s1 = inlined_call_operand.vmem [shape: f32[1,32], index: 1, kind: input, shape index: {}]   ;;  %s167_s2 = inlined_call_operand.hbm [shape: f32[16,32], index: 2, kind: output, shape index: {}]  }
   0x1   :  { %8 = vsyncpa [#allocation4], 0  ;;  %s127_s9 = smov [#allocation2]  }
   0x2   :  { %s14_s10 = sshll.u32 %s127_s9, 4  ;;  %s15_s10 = int_to_ptr.vmem [resolvable:$true] %s14_s10 }
   0x3   :  { %s91_s11 = scalar_lea.vmem %s15_s10, 256  ;;  %p96_p1 = scmp.lt.s32.totalorder %s15_s10, %s15_s10 }
   0x4   :  { %p92_p0 = scmp.ne.s32.totalorder %s15_s10, %s91_s11  ;;  %p97_p2 = scmp.lt.s32.totalorder %s91_s11, %s91_s11 }
   0x6   :  { %p98_p3 = por %p97_p2, %p96_p1 }
   0x8   :  { %p99_p4 = pnand %p98_p3, %p92_p0 }
   0xa   :  { %102 = shalt.err (!%p99_p4)
}
   0xb   :  { %s128_s12 = smov 128   ;;  %s129_s13 = smov 8  }
   0xc   :  { %20 = dma.hbm_to_vmem [thread:$0]  %s165_s0, 256, %s15_s10, [#allocation3], %s128_s12, %s128_s12, %s129_s13  }
   0xd   :  { %123 = dma.done.wait [#allocation3], 256  }
   0xe   :  { %124 = vsyncadd [#allocation3], 4294967040  ;;  %v26_v0 = vld [vmem:[#allocation2] sm:$0xff]  ;;  %vm30_vm0 = vcmask 261120   ;;  %v27_v1 = vld [vmem:[#allocation2 + $0x8] sm:$0xff]  ;;  %s130_s17 = smov [#allocation5]  }
   0xf   :  { %v28_v2 = vmul.f32 %v26_v0, %v26_v0  ;;  %v29_v3 = vmul.f32 %v27_v1, %v27_v1  ;;  %v74_v13 = vld [vmem:[%s166_s1] ss:$0 sm:$0xff]  ;;  %s62_s18 = sshll.u32 %s130_s17, 4  ;;  %s63_s18 = int_to_ptr.vmem [resolvable:$true] %s62_s18 }
  0x10   :  { %s103_s19 = scalar_lea.vmem %s63_s18, 256  ;;  %p108_p6 = scmp.lt.s32.totalorder %s63_s18, %s63_s18 }
  0x11   :  { %v31_v4 = vsel %vm30_vm0, %v28_v2, 0.0  ;;  %v34_v5 = vsel %vm30_vm0, %v29_v3, 0.0  ;;  %p104_p5 = scmp.ne.s32.totalorder %s63_s18, %s103_s19  ;;  %p109_p7 = scmp.lt.s32.totalorder %s103_s19, %s103_s19 }
  0x12   :  { %32 = vadd.xlane.f32.xlu0 %v31_v4 }
  0x13   :  { %p110_p8 = por %p109_p7, %p108_p6 }
  0x15   :  { %p111_p9 = pnand %p110_p8, %p104_p5 }
  0x16   :  { %35 = vadd.xlane.f32.xlu0 %v34_v5 }
  0x9b   :  { %v33_v6 = vpop.xlane.xlu0 %32 }
  0x9c   :  { %v38_v7 = vmul.f32 0.03125, %v33_v6 }
  0x9e   :  { %v40_v8 = vadd.f32 1e-06, %v38_v7 }
  0x9f   :  { %v36_v9 = vpop.xlane.xlu0 %35 }
  0xa0   :  { %79 = vrsqrt.f32 %v40_v8  ;;  %v39_v10 = vmul.f32 0.03125, %v36_v9 }
  0xa2   :  { %v41_v11 = vadd.f32 1e-06, %v39_v10 }
  0xa4   :  { %81 = vrsqrt.f32 %v41_v11 }
  0xad   :  { %v80_v12 = vpop.eup %79 }
  0xae   :  { %v44_v14 = vmul.f32 %v80_v12, %v26_v0 }
  0xb0   :  { %v53_v15 = vmul.f32 %v74_v13, %v44_v14 }
  0xb1   :  { %v82_v16 = vpop.eup %81 }
  0xb2   :  { %v45_v17 = vmul.f32 %v82_v16, %v27_v1  ;;  %55 = vst.msk [vmem:[#allocation5] sm:$0xff] %vm30_vm0, %v53_v15 }
  0xb4   :  { %v54_v18 = vmul.f32 %v74_v13, %v45_v17 }
  0xb6   :  { %56 = vst.msk [vmem:[#allocation5 + $0x8] sm:$0xff] %vm30_vm0, %v54_v18 }
  0xb7   :  { %114 = shalt.err (!%p111_p9)
}
  0xb8   :  { %68 = dma.vmem_to_hbm [thread:$0]  %s63_s18, 256, %s167_s2, [#allocation4], %s128_s12, %s128_s12, %s129_s13  }
  0xb9   :  { %125 = dma.done.wait [#allocation4], 256  }
  0xba   :  { %126 = vsyncadd [#allocation4], 4294967040 }
  0xbb   :  { %72 = vsyncpa [#allocation3], 1 }
  0xbc   :  { %73 = vsyncpa [#allocation4], 1 }

</bundles_post_ra>
